<compile_context>
chip_gen: v5e
topology: v5e:2x2
jax: 0.10.0
libtpu: 0.0.40
codegen_flags: <defaults>
</compile_context>

<pallas_src>
import jax
import jax.numpy as jnp
from jax.experimental import pallas as pl
from jax.experimental.pallas import tpu as pltpu


def _round_up(x, m):
    return ((x + m - 1) // m) * m


def _make_kernel(*, output_type, conf, limit, tn, use_boxes):
    """Build the per-tile kernel. Tile t covers detections [t*tn, (t+1)*tn)."""

    def kernel(*refs):
        if use_boxes:
            post_ref, boxes_ref, out_ref, acc_ref, cutoff_ref = refs
        else:
            post_ref, out_ref, acc_ref, cutoff_ref = refs
            boxes_ref = None

        t = pl.program_id(0)

        @pl.when(t == 0)
        def _init():
            acc_ref[0] = jnp.float32(0.0)
            cutoff_ref[0] = jnp.int32(limit)   # running min(limit, first break idx)

        start = t * tn

        # Skip all vector work once the break (or the ratio limit) is behind us.
        @pl.when(cutoff_ref[0] > start)
        def _body():
            # Cast to f32 *after* the load: HBM/DMA stays in the narrow dtype.
            post = post_ref[...].astype(jnp.float32)            # (C, TN)
            row_max = jnp.max(post, axis=0, keepdims=True)      # (1, TN)

            g = start + jax.lax.broadcasted_iota(jnp.int32, (1, tn), 1)  # global idx

            # PyTorch breaks iff (max < conf) is True; NaN compares False, so a
            # NaN row does NOT break and its value is appended (propagates).
            fails = row_max < jnp.float32(conf)                 # (1, TN)
            local_ff = jnp.min(jnp.where(fails, g, jnp.int32(limit)))
            cutoff = jnp.minimum(cutoff_ref[0], local_ff)
            valid = g < cutoff                                  # (1, TN)

            if output_type == "box":
                contrib = jnp.sum(boxes_ref[...].astype(jnp.float32),
                                  axis=0, keepdims=True)        # (1, TN)
            elif output_type in ("class", "all"):
                # Module's elif means 'all' behaves like 'class'.
                contrib = row_max
            else:
                # Unknown output_type appends nothing in PyTorch -> sum is 0.
                contrib = jnp.zeros((1, tn), jnp.float32)

            acc_ref[0] += jnp.sum(jnp.where(valid, contrib, jnp.float32(0.0)))
            cutoff_ref[0] = cutoff

        # Write the (resident) scalar output every step; last step wins.
        out_ref[0, 0] = acc_ref[0]

    return kernel


def yolov8_target_pallas(post_result, pre_post_boxes, *,
                         output_type, conf, ratio, block_n=1024):
    """Pallas equivalent of yolov8_target.forward((post_result, pre_post_boxes)).

    post_result:    (N, C) class scores (any float dtype; bf16 recommended)
    pre_post_boxes: (N, 4) box coords
    """
    n, c = post_result.shape
    limit = max(0, min(int(n * ratio), n))
    use_boxes = (output_type == "box")

    # Lane-dense layout: put N on the lane axis.  (Ideally the producer already
    # emits (C, N); the transpose here is layout plumbing, not compute.)
    post_t = post_result.T                                      # (C, N)

    # Tile width: multiple of 128 lanes; largest tile that covers N if small.
    # (C, tn) in f32 stays far below the 32 MiB scoped-VMEM default even on v7x.
    tn = max(128, min(_round_up(int(block_n), 128), _round_up(n, 128)))
    n_pad = _round_up(n, tn)
    if n_pad != n:
        post_t = jnp.pad(post_t, ((0, 0), (0, n_pad - n)))      # pad cols masked by limit

    operands = [post_t]
    in_specs = [pl.BlockSpec((c, tn), lambda t: (0, t))]
    if use_boxes:
        boxes_t = pre_post_boxes.T                              # (4, N)
        if n_pad != n:
            boxes_t = jnp.pad(boxes_t, ((0, 0), (0, n_pad - n)))
        operands.append(boxes_t)
        in_specs.append(pl.BlockSpec((4, tn), lambda t: (0, t)))

    kernel = _make_kernel(output_type=output_type, conf=float(conf),
                          limit=limit, tn=tn, use_boxes=use_boxes)

    out = pl.pallas_call(
        kernel,
        out_shape=jax.ShapeDtypeStruct((1, 1), jnp.float32),
        grid_spec=pltpu.PrefetchScalarGridSpec(
            num_scalar_prefetch=0,
            grid=(n_pad // tn,),
            in_specs=in_specs,
            out_specs=pl.BlockSpec(memory_space=pltpu.SMEM),
            scratch_shapes=[
                pltpu.SMEM((1,), jnp.float32),   # running sum
                pltpu.SMEM((1,), jnp.int32),     # running cutoff (break/limit)
            ],
        ),
        compiler_params=pltpu.CompilerParams(
            # Prefix (break) dependency -> sequential reduction axis.
            dimension_semantics=("arbitrary",)),
    )(*operands)
    return out[0, 0]


def _reference(post, boxes, *, output_type, conf, ratio):
    """Pure-Python replica of the PyTorch forward (for validation)."""
    n = post.shape[0]
    result = []
    for i in range(int(n * ratio)):
        if float(post[i].max()) < conf:
            break
        if output_type in ("class", "all"):
            result.append(float(post[i].max()))
        elif output_type == "box":
            for j in range(4):
                result.append(float(boxes[i, j]))
    return float(sum(result))


if __name__ == "__main__":
    import numpy as np

    key = jax.random.PRNGKey(0)
    k1, k2, k3, k4 = jax.random.split(key, 4)

    def check(post, boxes, output_type, conf, ratio, block_n, tol):
        got = yolov8_target_pallas(post, boxes, output_type=output_type,
                                   conf=conf, ratio=ratio, block_n=block_n)
        got = float(jax.block_until_ready(got))
        post_np = np.asarray(post.astype(jnp.float32))
        boxes_np = np.asarray(boxes.astype(jnp.float32))
        want = _reference(post_np, boxes_np,
                          output_type=output_type, conf=conf, ratio=ratio)
        if abs(got - want) > tol * (1.0 + abs(want)):
            print(f"MISMATCH type={output_type} N={post.shape[0]}: "
                  f"got {got}, want {want}")
            return False
        return True

    ok = True

    # Case 1: tiny f32 inputs, single 128-wide tile.
    N1, C1 = 8, 16
    post1 = jax.random.uniform(k1, (N1, C1), dtype=jnp.float32)
    boxes1 = jax.random.uniform(k2, (N1, 4), dtype=jnp.float32) * 16.0
    for ot in ("all", "class", "box"):
        ok &= check(post1, boxes1, ot, conf=0.6, ratio=0.75, block_n=1024, tol=1e-4)

    # Case 2: bf16 inputs (narrow dtype kept in HBM), 3 tiles of 128, and a
    # confidence drop at row 150 to exercise the cross-tile break + tile skip.
    N2, C2 = 300, 20
    scores = jax.random.uniform(k3, (N2, C2), dtype=jnp.float32)
    scale = jnp.where(jnp.arange(N2)[:, None] < 150, 1.0, 0.05)
    post2 = (scores * scale).astype(jnp.bfloat16)
    boxes2 = (jax.random.uniform(k4, (N2, 4), dtype=jnp.float32) * 16.0
              ).astype(jnp.bfloat16)
    for ot in ("all", "box"):
        ok &= check(post2, boxes2, ot, conf=0.6, ratio=0.8, block_n=128, tol=1e-3)

    if ok:
        print("KERNEL_OK")
</pallas_src>

<mosaic_0001>
module attributes {stable_mosaic.version = 11 : i64} {
  func.func @kernel(%arg0: i32, %arg1: memref<16x128xf32, #tpu.memory_space<vmem>>, %arg2: memref<1x1xf32, #tpu.memory_space<smem>>, %arg3: memref<1xf32, #tpu.memory_space<smem>>, %arg4: memref<1xi32, #tpu.memory_space<smem>>) attributes {dimension_semantics = [#tpu.dimension_semantics<arbitrary>], iteration_bounds = array<i64: 1>, scalar_prefetch = 0 : i64, scratch_operands = 2 : i64, tpu.core_type = #tpu.core_type<tc>, window_params = [{transform_indices = @transform_0, window_bounds = array<i64: 16, 128>}, {transform_indices = @transform_1, window_bounds = array<i64: 1, 1>}]} {
    %c0_i32 = arith.constant 0 : i32
    %0 = arith.cmpi eq, %arg0, %c0_i32 : i32
    %1 = arith.extui %0 : i1 to i32
    %c0_i32_0 = arith.constant 0 : i32
    %2 = arith.cmpi ne, %1, %c0_i32_0 : i32
    scf.if %2 {
      %cst = arith.constant 0.000000e+00 : f32
      %c0_5 = arith.constant 0 : index
      %10 = memref.load %arg3[%c0_5] : memref<1xf32, #tpu.memory_space<smem>>
      memref.store %cst, %arg3[%c0_5] : memref<1xf32, #tpu.memory_space<smem>>
      %c6_i32 = arith.constant 6 : i32
      %c0_6 = arith.constant 0 : index
      %11 = memref.load %arg4[%c0_6] : memref<1xi32, #tpu.memory_space<smem>>
      memref.store %c6_i32, %arg4[%c0_6] : memref<1xi32, #tpu.memory_space<smem>>
    } else {
    }
    %c128_i32 = arith.constant 128 : i32
    %3 = arith.muli %arg0, %c128_i32 : i32
    %c0 = arith.constant 0 : index
    %4 = memref.load %arg4[%c0] : memref<1xi32, #tpu.memory_space<smem>>
    %5 = arith.cmpi sgt, %4, %3 : i32
    %6 = arith.extui %5 : i1 to i32
    %c0_i32_1 = arith.constant 0 : i32
    %7 = arith.cmpi ne, %6, %c0_i32_1 : i32
    scf.if %7 {
      %c0_5 = arith.constant 0 : index
      %c0_6 = arith.constant 0 : index
      %10 = vector.load %arg1[%c0_5, %c0_6] : memref<16x128xf32, #tpu.memory_space<vmem>>, vector<16x128xf32>
      %cst = arith.constant dense<0xFF800000> : vector<128xf32>
      %11 = vector.multi_reduction <maximumf>, %10, %cst [0] : vector<16x128xf32> to vector<128xf32>
      %12 = vector.shape_cast %11 : vector<128xf32> to vector<1x128xf32>
      %13 = tpu.iota {dimensions = array<i32: 1>} : vector<1x128xi32>
      %14 = vector.broadcast %3 : i32 to vector<1x128xi32>
      %15 = arith.addi %14, %13 : vector<1x128xi32>
      %cst_7 = arith.constant 6.000000e-01 : f32
      %16 = vector.broadcast %cst_7 : f32 to vector<1x128xf32>
      %17 = arith.cmpf olt, %12, %16 : vector<1x128xf32>
      %c6_i32 = arith.constant 6 : i32
      %18 = vector.broadcast %c6_i32 : i32 to vector<1x128xi32>
      %19 = arith.select %17, %15, %18 : vector<1x128xi1>, vector<1x128xi32>
      %20 = vector.shape_cast %19 : vector<1x128xi32> to vector<1x1x128xi32>
      %cst_8 = arith.constant dense<2147483647> : vector<1xi32>
      %21 = vector.multi_reduction <minsi>, %20, %cst_8 [1, 2] : vector<1x1x128xi32> to vector<1xi32>
      %22 = vector.shape_cast %21 : vector<1xi32> to vector<1x1x1xi32>
      %23 = vector.extract %22[0, 0, 0] : i32 from vector<1x1x1xi32>
      %c0_9 = arith.constant 0 : index
      %24 = memref.load %arg4[%c0_9] : memref<1xi32, #tpu.memory_space<smem>>
      %25 = arith.minsi %24, %23 : i32
      %26 = vector.broadcast %25 : i32 to vector<1x128xi32>
      %27 = arith.cmpi slt, %15, %26 : vector<1x128xi32>
      %c0_10 = arith.constant 0 : index
      %28 = memref.load %arg3[%c0_10] : memref<1xf32, #tpu.memory_space<smem>>
      %cst_11 = arith.constant 0.000000e+00 : f32
      %29 = vector.broadcast %cst_11 : f32 to vector<1x128xf32>
      %30 = arith.select %27, %12, %29 : vector<1x128xi1>, vector<1x128xf32>
      %31 = vector.shape_cast %30 : vector<1x128xf32> to vector<1x1x128xf32>
      %cst_12 = arith.constant dense<0.000000e+00> : vector<1xf32>
      %32 = vector.multi_reduction <add>, %31, %cst_12 [1, 2] : vector<1x1x128xf32> to vector<1xf32>
      %33 = vector.shape_cast %32 : vector<1xf32> to vector<1x1x1xf32>
      %34 = vector.extract %33[0, 0, 0] : f32 from vector<1x1x1xf32>
      %35 = arith.addf %28, %34 : f32
      %c0_13 = arith.constant 0 : index
      %36 = memref.load %arg3[%c0_13] : memref<1xf32, #tpu.memory_space<smem>>
      memref.store %35, %arg3[%c0_13] : memref<1xf32, #tpu.memory_space<smem>>
      %c0_14 = arith.constant 0 : index
      %37 = memref.load %arg4[%c0_14] : memref<1xi32, #tpu.memory_space<smem>>
      memref.store %25, %arg4[%c0_14] : memref<1xi32, #tpu.memory_space<smem>>
    } else {
    }
    %c0_2 = arith.constant 0 : index
    %8 = memref.load %arg3[%c0_2] : memref<1xf32, #tpu.memory_space<smem>>
    %c0_3 = arith.constant 0 : index
    %c0_4 = arith.constant 0 : index
    %9 = memref.load %arg2[%c0_3, %c0_4] : memref<1x1xf32, #tpu.memory_space<smem>>
    memref.store %8, %arg2[%c0_3, %c0_4] : memref<1x1xf32, #tpu.memory_space<smem>>
    return
  }
  func.func @transform_0(%arg0: i32) -> (i32, i32) {
    %c0_i32 = arith.constant 0 : i32
    %c0_i32_0 = arith.constant 0 : i32
    return %c0_i32, %arg0 : i32, i32
  }
  func.func @transform_1(%arg0: i32) -> (i32, i32) {
    %c0_i32 = arith.constant 0 : i32
    %c0_i32_0 = arith.constant 0 : i32
    %c0_i32_1 = arith.constant 0 : i32
    return %c0_i32, %c0_i32_0 : i32, i32
  }
}

</mosaic_0001>

<bundles_post_ra>
// kernel: tpu_custom_call.1
= control target key start
LH: loop header
LB: loop body
LE: loop exit
PB: predicated region body
PF: predicated region fallthrough
CT: control target
= control target key end

     0   :  { %6 = vsyncpa [#allocation5], 0  ;;  %s185_s0 = inlined_call_operand.hbm [shape: f32[16,128], index: 0, kind: input, shape index: {}]   ;;  %s186_s1 = inlined_call_operand.hbm [shape: f32[1,1], index: 1, kind: output, shape index: {}]  }
   0x1   :  { %7 = vsyncpa [#allocation6], 0  ;;  %s12_s8 = sshll.u32 %s185_s0, 4  ;;  %s163_s9 = smov [#allocation4]   ;;  %s13_s8 = int_to_ptr.hbm [resolvable:$true] %s12_s8 }
   0x2   :  { %s14_s10 = sshll.u32 %s163_s9, 4  ;;  %s164_s11 = smov 128   ;;  %s15_s10 = int_to_ptr.vmem [resolvable:$true] %s14_s10 }
   0x3   :  { %s165_s12 = smov 8  }
   0x4   :  { %20 = dma.hbm_to_vmem [thread:$0]  %s13_s8, 256, %s15_s10, [#allocation5], %s164_s11, %s164_s11, %s165_s12  }
   0x5   :  { %159 = dma.done.wait [#allocation5], 256  }
   0x6   :  { %160 = vsyncadd [#allocation5], 4294967040  ;;  %s166_s13 = smov 0.0   ;;  %s167_s14 = smov 6   ;;  %v39_v0 = vld [vmem:[#allocation4] sm:$0xff]  ;;  %v40_v1 = vld [vmem:[#allocation4 + $0x8] sm:$0xff]  ;;  %v48_v6 = vlaneseq }
   0x7   :  { %30 = sst [smem:[#allocation2]] %s166_s13  ;;  %v41_v2 = vmax.f32 %v39_v0, %v40_v1  ;;  %vm76_vm2 = vcmask 1040384   ;;  %s100_s22 = sshll.u32 %s186_s1, 4  ;;  %s101_s22 = int_to_ptr.hbm [resolvable:$true] %s100_s22 }
   0x8   :  { %32 = sst [smem:[#allocation3]] %s167_s14  ;;  %v49_v9 = vand.u32 127, %v48_v6  ;;  %s168_s23 = smov [#allocation7]  }
   0x9   :  { %v42_v3 = vrot.slane %v41_v2, 4  ;;  %s69_s0 = sld [smem:[#allocation3]] }
   0xa   :  { %s74_s16 = sld [smem:[#allocation2]] }
   0xb   :  { %v43_v4 = vmax.f32 %v41_v2, %v42_v3 }
   0xd   :  { %v44_v5 = vrot.slane %v43_v4, 2 }
   0xf   :  { %v45_v7 = vmax.f32 %v43_v4, %v44_v5 }
  0x11   :  { %v46_v8 = vrot.slane %v45_v7, 1 }
  0x13   :  { %v47_v10 = vmax.f32 %v45_v7, %v46_v8 }
  0x15   :  { %vm52_vm0 = vcmp.lt.f32.partialorder %v47_v10, 0.6 }
  0x16   :  { %v53_v11 = vsel %vm52_vm0, %v49_v9, 6 }
  0x17   :  { %v55_v12 = vshra.s32 %v53_v11, 16  ;;  %v54_v14 = vand.u32 65535, %v53_v11 }
  0x19   :  { %v57_v13 = vcvt.s32.f32 %v55_v12  ;;  %v56_v15 = vcvt.s32.f32 %v54_v14 }
  0x1b   :  { %58 = vmin.xlane.f32.xlu0 %v57_v13 }
  0x8e   :  { %v59_v16 = vpop.xlane.xlu0 %58 }
  0x8f   :  { %vm60_vm1 = vcmp.eq.f32.partialorder %v57_v13, %v59_v16  ;;  %v65_v18 = vcvt.f32.s32 %v59_v16 }
  0x90   :  { %v61_v17 = vsel %vm60_vm1, %v56_v15, inf }
  0x91   :  { %62 = vmin.xlane.f32.xlu0 %v61_v17  ;;  %v66_v21 = vshll.u32 %v65_v18, 16 }
 0x104   :  { %v63_v19 = vpop.xlane.xlu0 %62 }
 0x105   :  { %v64_v20 = vcvt.f32.s32 %v63_v19 }
 0x107   :  { %v67_v22 = vadd.s32 %v66_v21, %v64_v20 }
 0x109   :  { %112 = vpush %v67_v22 }
 0x13a   :  { %s113_s15 = spop %112 }
 0x13b   :  { %p70_p0 = scmp.lt.s32.totalorder %s69_s0, %s113_s15 }
 0x13d   :  { %s188_s0 = smov (!%p70_p0, %s69_s0), %s113_s15 }
 0x13e   :  { %91 = sst [smem:[#allocation3]] %s188_s0  ;;  %v72_v23 = vstv %s188_s0 }
 0x13f   :  { %vm73_vm3 = vcmp.lt.s32.totalorder %v49_v9, %v72_v23 }
 0x140   :  { %v75_v24 = vsel %vm73_vm3, %v47_v10, 0.0 }
 0x141   :  { %v77_v25 = vsel %vm76_vm2, %v75_v24, 0.0 }
 0x142   :  { %78 = vadd.xlane.f32.xlu1 %v77_v25 }
 0x1b5   :  { %v79_v26 = vpop.xlane.xlu1 %78 }
 0x1b6   :  { %v80_v27 = vrot.slane %v79_v26, 4 }
 0x1b8   :  { %v81_v28 = vadd.f32 %v80_v27, %v79_v26 }
 0x1ba   :  { %v82_v29 = vrot.slane %v81_v28, 2 }
 0x1bc   :  { %v83_v30 = vadd.f32 %v82_v29, %v81_v28 }
 0x1be   :  { %v84_v31 = vrot.slane %v83_v30, 1 }
 0x1c0   :  { %v85_v32 = vadd.f32 %v84_v31, %v83_v30 }
 0x1c2   :  { %114 = vpush %v85_v32 }
 0x1f3   :  { %s115_s17 = spop %114 }
 0x1f4   :  { %s87_s18 = sadd.f32 %s115_s17, %s74_s16 }
 0x1f6   :  { %89 = sst [smem:[#allocation2]] %s87_s18 }
 0x1f7   :  { %s92_s19 = sld [smem:[#allocation2]] }
 0x1fd   :  { %94 = sst [smem:[#allocation7]] %s92_s19 }
 0x1fe   :  { %103 = dma.smem_to_hbm %s168_s23, 16, %s101_s22, [#allocation6]  }
 0x1ff   :  { %161 = dma.done.wait [#allocation6], 16  }
 0x200   :  { %162 = vsyncadd [#allocation6], 4294967280 }
 0x201   :  { %108 = sfence }
 0x202   :  { %109 = vsyncpa [#allocation5], 1 }
 0x203   :  { %110 = vsyncpa [#allocation6], 1 }

</bundles_post_ra>
